<compile_context>
chip_gen: v7x
topology: tpu7x:2x2x1
jax: 0.10.0
libtpu: 0.0.40
codegen_flags: <defaults>
</compile_context>

<pallas_src>
import jax
import jax.numpy as jnp
from jax.experimental import pallas as pl
from jax.experimental.pallas import tpu as pltpu

K = 7                # conv kernel size
PAD = (K - 1) // 2   # 'same' padding


def deepclean_kernel(x_ref, w1_ref, b1_ref, w2_ref, gsum_ref, b2_ref,
                     out_ref, hpad_ref):
    BbH, Tp = hpad_ref.shape
    T = Tp - 2 * PAD

    # ---- conv1 (C -> H, k=7, 'same') with the input scaler folded into w1/b1 ----
    # Per-tap block-diagonal matmuls over the whole batch block (no im2col concat:
    # at these shapes the kernel is vld/XLU-bound, so K extra slab copies cost more
    # than K shallow MXU contractions), f32 accumulation.  The host-side time padding
    # carries the per-channel mean, so edge taps contribute exactly zero in the
    # normalized domain (matches zero-padded Conv1d on the scaled signal).
    acc = jnp.dot(w1_ref[0], x_ref[:, 0:T], preferred_element_type=jnp.float32)
    for k in range(1, K):
        acc = acc + jnp.dot(w1_ref[k], x_ref[:, k:k + T],
                            preferred_element_type=jnp.float32)
    h = jnp.tanh(acc + b1_ref[...])                         # (Bb*H, T), bias broadcast once

    # ---- zero-padded staging of h for the conv2 taps ----
    # Pad columns are re-zeroed every grid step (NOT behind pl.when(step == 0)) so the
    # kernel stays correct if the 'parallel' batch axis is sharded across TensorCores.
    zeros_edge = jnp.zeros((BbH, PAD), jnp.float32)
    hpad_ref[:, 0:PAD] = zeros_edge
    hpad_ref[:, T + PAD:Tp] = zeros_edge
    hpad_ref[:, PAD:PAD + T] = h                            # one whole-block interior store

    # ---- conv2 (H -> 1, k=7, 'same') with the output scaler folded into w2/b2 ----
    # Per-tap scale-accumulate on the VPU over the whole (Bb*H, T) slab (w2 pre-tiled
    # across batch groups on the host), then one block-diagonal ones-matrix dot collapses
    # each H-row group -> a single dense, lane-dense (Bb, T) store.
    acc2 = hpad_ref[:, 0:T] * w2_ref[:, 0:1]
    for k in range(1, K):
        acc2 = acc2 + hpad_ref[:, k:k + T] * w2_ref[:, k:k + 1]
    y = jnp.dot(gsum_ref[...], acc2, preferred_element_type=jnp.float32) + b2_ref[0]
    out_ref[...] = y                                        # dense (Bb, T) slab store


def _const_spec(arr):
    nd = arr.ndim
    return pl.BlockSpec(arr.shape, lambda i, _nd=nd: (0,) * _nd)


_SMEM_SPEC = pl.BlockSpec(memory_space=pltpu.MemorySpace.SMEM)


def _pick_batch_block(B):
    # Whole (small) batch per grid step keeps the ~0.35us/step overhead minimal on
    # 1-TC chips; for larger batches use 8-row blocks so the output BlockSpec stays
    # sublane-dense and the 'parallel' batch axis can round-robin across v7x's 2 TCs.
    if B % 8 == 0 and B >= 16:
        return 8
    return B


def deepclean_forward(x, params):
    """x: (B, C, T) f32; params in PyTorch layouts.  Returns (B, T)."""
    mean_in, std_in, w1, b1, w2, b2, mean_out, std_out = params
    B, C, T = x.shape
    H = w1.shape[0]
    Tp = T + 2 * PAD
    C_pad = ((C + 7) // 8) * 8        # channel rows padded to a sublane multiple

    # ---- host-side parameter folding (exact; conv is linear) ----
    inv_in = (1.0 / std_in).reshape(C)
    mu_in = mean_in.reshape(C)
    w1f = w1 * inv_in.reshape(1, C, 1)                                    # (H, C, K)
    b1f = b1.reshape(H) - jnp.sum(w1f * mu_in.reshape(1, C, 1), axis=(1, 2))
    s_out = std_out.reshape(())
    m_out = mean_out.reshape(())
    w2f = w2[0] * s_out                                                   # (H, K)
    b2f = (b2.reshape(()) * s_out + m_out).reshape(1)

    b_blk = _pick_batch_block(B)
    assert B % b_blk == 0
    grid = (B // b_blk,)

    # Per-tap block-diagonal conv1 weights over the batch block -> one dot per tap for
    # the whole block.  Extra (padded) channels get zero weights.
    w1f = jnp.pad(w1f, ((0, 0), (0, C_pad - C), (0, 0)))                  # (H, C_pad, K)
    eye_b = jnp.eye(b_blk, dtype=jnp.float32)
    w1_bd = jnp.stack([jnp.kron(eye_b, w1f[:, :, k]) for k in range(K)],
                      axis=0)                                             # (K, Bb*H, Bb*C_pad)
    b1_t = jnp.tile(b1f, b_blk).reshape(b_blk * H, 1)                     # (Bb*H, 1)
    w2_t = jnp.tile(w2f, (b_blk, 1))                                      # (Bb*H, K)
    gsum = jnp.kron(eye_b, jnp.ones((1, H), jnp.float32))                 # (Bb, Bb*H)

    # ---- host-side input massaging ----
    # Pad time with the per-channel mean (so the folded conv sees zero in the normalized
    # domain at the edges), pad channels to a sublane multiple (zero data + zero weights)
    # and flatten to 2-D row slabs: the kernel's input block needs no in-kernel staging.
    pad_cols = jnp.broadcast_to(mu_in.reshape(1, C, 1), (B, C, PAD)).astype(x.dtype)
    xp = jnp.concatenate([pad_cols, x, pad_cols], axis=-1)                # (B, C, Tp)
    xp = jnp.pad(xp, ((0, 0), (0, C_pad - C), (0, 0)))                    # (B, C_pad, Tp)
    x_rows = xp.reshape(B * C_pad, Tp)                                    # (B*C_pad, Tp)

    # Rough VMEM budget (double-buffered input block + h scratch); T-tile before this trips.
    vmem_est = 2 * (b_blk * C_pad * Tp * 4) + b_blk * H * Tp * 4
    assert vmem_est < 16 * 1024 * 1024, "block too large: add a halo'd T-tile grid axis"

    out = pl.pallas_call(
        deepclean_kernel,
        out_shape=jax.ShapeDtypeStruct((B, T), jnp.float32),
        grid=grid,
        in_specs=[
            pl.BlockSpec((b_blk * C_pad, Tp), lambda i: (i, 0)),   # padded signal rows
            _const_spec(w1_bd),                                    # conv1 block-diag taps
            _const_spec(b1_t),                                     # folded conv1 bias
            _const_spec(w2_t),                                     # conv2 taps (batch-tiled)
            _const_spec(gsum),                                     # H-group summing matrix
            _SMEM_SPEC,                                            # folded conv2 bias (scalar)
        ],
        out_specs=pl.BlockSpec((b_blk, T), lambda i: (i, 0)),      # dense (Bb, T) slab
        scratch_shapes=[
            pltpu.VMEM((b_blk * H, Tp), jnp.float32),              # zero-padded h staging
        ],
        compiler_params=pltpu.CompilerParams(
            dimension_semantics=("parallel",)),
    )(x_rows, w1_bd, b1_t, w2_t, gsum, b2f)
    return out


def deepclean_ref(x, params):
    """Pure-JAX reference mirroring the PyTorch forward (original, unfused math)."""
    mean_in, std_in, w1, b1, w2, b2, mean_out, std_out = params
    xn = (x - mean_in[None]) / std_in[None]
    dn = ("NCH", "OIH", "NCH")
    h = jax.lax.conv_general_dilated(xn, w1, (1,), [(PAD, PAD)], dimension_numbers=dn)
    h = jnp.tanh(h + b1.reshape(1, -1, 1))
    y = jax.lax.conv_general_dilated(h, w2, (1,), [(PAD, PAD)], dimension_numbers=dn)
    y = y + b2.reshape(1, 1, 1)
    y = y * std_out + mean_out
    return y[:, 0, :]


if __name__ == "__main__":
    B, C, T, H = 2, 4, 256, 8

    key = jax.random.PRNGKey(0)
    kx, km, ks, kw1, kb1, kw2, kb2, kmo, kso = jax.random.split(key, 9)

    x = jax.random.normal(kx, (B, C, T), dtype=jnp.float32)

    # ChannelWiseScaler parameters (std > 0)
    mean_in = jax.random.normal(km, (C, 1), dtype=jnp.float32)
    std_in = 0.5 + jax.random.uniform(ks, (C, 1), dtype=jnp.float32)
    mean_out = jax.random.normal(kmo, (1, 1), dtype=jnp.float32)
    std_out = 0.5 + jax.random.uniform(kso, (1, 1), dtype=jnp.float32)

    # Conv weights in PyTorch Conv1d layout (Cout, Cin, K)
    w1 = 0.1 * jax.random.normal(kw1, (H, C, K), dtype=jnp.float32)
    b1 = 0.1 * jax.random.normal(kb1, (H, 1), dtype=jnp.float32)
    w2 = 0.1 * jax.random.normal(kw2, (1, H, K), dtype=jnp.float32)
    b2 = 0.1 * jax.random.normal(kb2, (1, 1), dtype=jnp.float32)

    params = (mean_in, std_in, w1, b1, w2, b2, mean_out, std_out)

    y = deepclean_forward(x, params)
    y = jax.block_until_ready(y)

    y_ref = deepclean_ref(x, params)
    assert y.shape == (B, T)
    err = float(jnp.max(jnp.abs(y - y_ref)))
    assert jnp.allclose(y, y_ref, atol=1e-4, rtol=1e-4), f"max err {err}"

    print("KERNEL_OK")
</pallas_src>

<mosaic_0001>
module attributes {stable_mosaic.version = 11 : i64} {
  func.func @deepclean_kernel(%arg0: i32, %arg1: memref<16x262xf32, #tpu.memory_space<vmem>>, %arg2: memref<7x16x16xf32, #tpu.memory_space<vmem>>, %arg3: memref<16x1xf32, #tpu.memory_space<vmem>>, %arg4: memref<16x7xf32, #tpu.memory_space<vmem>>, %arg5: memref<2x16xf32, #tpu.memory_space<vmem>>, %arg6: memref<1xf32, #tpu.memory_space<smem>>, %arg7: memref<2x256xf32, #tpu.memory_space<vmem>>, %arg8: memref<16x262xf32, #tpu.memory_space<vmem>>) attributes {dimension_semantics = [#tpu.dimension_semantics<parallel>], iteration_bounds = array<i64: 1>, scalar_prefetch = 0 : i64, scratch_operands = 1 : i64, tpu.core_type = #tpu.core_type<tc>, window_params = [{transform_indices = @transform_0, window_bounds = array<i64: 16, 262>}, {pipeline_mode = #tpu.pipeline_mode<synchronous>, transform_indices = @transform_1, window_bounds = array<i64: 7, 16, 16>}, {pipeline_mode = #tpu.pipeline_mode<synchronous>, transform_indices = @transform_2, window_bounds = array<i64: 16, 1>}, {pipeline_mode = #tpu.pipeline_mode<synchronous>, transform_indices = @transform_3, window_bounds = array<i64: 16, 7>}, {pipeline_mode = #tpu.pipeline_mode<synchronous>, transform_indices = @transform_4, window_bounds = array<i64: 2, 16>}, {transform_indices = @transform_5, window_bounds = array<i64: 1>}, {transform_indices = @transform_6, window_bounds = array<i64: 2, 256>}]} {
    %c0 = arith.constant 0 : index
    %c0_0 = arith.constant 0 : index
    %c0_1 = arith.constant 0 : index
    %0 = vector.load %arg2[%c0, %c0_0, %c0_1] : memref<7x16x16xf32, #tpu.memory_space<vmem>>, vector<1x16x16xf32>
    %1 = vector.shape_cast %0 : vector<1x16x16xf32> to vector<16x16xf32>
    %c0_2 = arith.constant 0 : index
    %c0_3 = arith.constant 0 : index
    %2 = vector.load %arg1[%c0_2, %c0_3] : memref<16x262xf32, #tpu.memory_space<vmem>>, vector<16x256xf32>
    %cst = arith.constant dense<0.000000e+00> : vector<16x256xf32>
    %3 = tpu.matmul %1, %2, %cst {dimension_numbers = #tpu.dot_dimension_numbers<[1], [0], [0], [1], [0, 0, 1, 1], [], []>} : vector<16x16xf32>, vector<16x256xf32>, vector<16x256xf32> -> vector<16x256xf32>
    %c1 = arith.constant 1 : index
    %c0_4 = arith.constant 0 : index
    %c0_5 = arith.constant 0 : index
    %4 = vector.load %arg2[%c1, %c0_4, %c0_5] : memref<7x16x16xf32, #tpu.memory_space<vmem>>, vector<1x16x16xf32>
    %5 = vector.shape_cast %4 : vector<1x16x16xf32> to vector<16x16xf32>
    %c0_6 = arith.constant 0 : index
    %c1_7 = arith.constant 1 : index
    %6 = vector.load %arg1[%c0_6, %c1_7] : memref<16x262xf32, #tpu.memory_space<vmem>>, vector<16x256xf32>
    %cst_8 = arith.constant dense<0.000000e+00> : vector<16x256xf32>
    %7 = tpu.matmul %5, %6, %cst_8 {dimension_numbers = #tpu.dot_dimension_numbers<[1], [0], [0], [1], [0, 0, 1, 1], [], []>} : vector<16x16xf32>, vector<16x256xf32>, vector<16x256xf32> -> vector<16x256xf32>
    %8 = arith.addf %3, %7 : vector<16x256xf32>
    %c2 = arith.constant 2 : index
    %c0_9 = arith.constant 0 : index
    %c0_10 = arith.constant 0 : index
    %9 = vector.load %arg2[%c2, %c0_9, %c0_10] : memref<7x16x16xf32, #tpu.memory_space<vmem>>, vector<1x16x16xf32>
    %10 = vector.shape_cast %9 : vector<1x16x16xf32> to vector<16x16xf32>
    %c0_11 = arith.constant 0 : index
    %c2_12 = arith.constant 2 : index
    %11 = vector.load %arg1[%c0_11, %c2_12] : memref<16x262xf32, #tpu.memory_space<vmem>>, vector<16x256xf32>
    %cst_13 = arith.constant dense<0.000000e+00> : vector<16x256xf32>
    %12 = tpu.matmul %10, %11, %cst_13 {dimension_numbers = #tpu.dot_dimension_numbers<[1], [0], [0], [1], [0, 0, 1, 1], [], []>} : vector<16x16xf32>, vector<16x256xf32>, vector<16x256xf32> -> vector<16x256xf32>
    %13 = arith.addf %8, %12 : vector<16x256xf32>
    %c3 = arith.constant 3 : index
    %c0_14 = arith.constant 0 : index
    %c0_15 = arith.constant 0 : index
    %14 = vector.load %arg2[%c3, %c0_14, %c0_15] : memref<7x16x16xf32, #tpu.memory_space<vmem>>, vector<1x16x16xf32>
    %15 = vector.shape_cast %14 : vector<1x16x16xf32> to vector<16x16xf32>
    %c0_16 = arith.constant 0 : index
    %c3_17 = arith.constant 3 : index
    %16 = vector.load %arg1[%c0_16, %c3_17] : memref<16x262xf32, #tpu.memory_space<vmem>>, vector<16x256xf32>
    %cst_18 = arith.constant dense<0.000000e+00> : vector<16x256xf32>
    %17 = tpu.matmul %15, %16, %cst_18 {dimension_numbers = #tpu.dot_dimension_numbers<[1], [0], [0], [1], [0, 0, 1, 1], [], []>} : vector<16x16xf32>, vector<16x256xf32>, vector<16x256xf32> -> vector<16x256xf32>
    %18 = arith.addf %13, %17 : vector<16x256xf32>
    %c4 = arith.constant 4 : index
    %c0_19 = arith.constant 0 : index
    %c0_20 = arith.constant 0 : index
    %19 = vector.load %arg2[%c4, %c0_19, %c0_20] : memref<7x16x16xf32, #tpu.memory_space<vmem>>, vector<1x16x16xf32>
    %20 = vector.shape_cast %19 : vector<1x16x16xf32> to vector<16x16xf32>
    %c0_21 = arith.constant 0 : index
    %c4_22 = arith.constant 4 : index
    %21 = vector.load %arg1[%c0_21, %c4_22] : memref<16x262xf32, #tpu.memory_space<vmem>>, vector<16x256xf32>
    %cst_23 = arith.constant dense<0.000000e+00> : vector<16x256xf32>
    %22 = tpu.matmul %20, %21, %cst_23 {dimension_numbers = #tpu.dot_dimension_numbers<[1], [0], [0], [1], [0, 0, 1, 1], [], []>} : vector<16x16xf32>, vector<16x256xf32>, vector<16x256xf32> -> vector<16x256xf32>
    %23 = arith.addf %18, %22 : vector<16x256xf32>
    %c5 = arith.constant 5 : index
    %c0_24 = arith.constant 0 : index
    %c0_25 = arith.constant 0 : index
    %24 = vector.load %arg2[%c5, %c0_24, %c0_25] : memref<7x16x16xf32, #tpu.memory_space<vmem>>, vector<1x16x16xf32>
    %25 = vector.shape_cast %24 : vector<1x16x16xf32> to vector<16x16xf32>
    %c0_26 = arith.constant 0 : index
    %c5_27 = arith.constant 5 : index
    %26 = vector.load %arg1[%c0_26, %c5_27] : memref<16x262xf32, #tpu.memory_space<vmem>>, vector<16x256xf32>
    %cst_28 = arith.constant dense<0.000000e+00> : vector<16x256xf32>
    %27 = tpu.matmul %25, %26, %cst_28 {dimension_numbers = #tpu.dot_dimension_numbers<[1], [0], [0], [1], [0, 0, 1, 1], [], []>} : vector<16x16xf32>, vector<16x256xf32>, vector<16x256xf32> -> vector<16x256xf32>
    %28 = arith.addf %23, %27 : vector<16x256xf32>
    %c6 = arith.constant 6 : index
    %c0_29 = arith.constant 0 : index
    %c0_30 = arith.constant 0 : index
    %29 = vector.load %arg2[%c6, %c0_29, %c0_30] : memref<7x16x16xf32, #tpu.memory_space<vmem>>, vector<1x16x16xf32>
    %30 = vector.shape_cast %29 : vector<1x16x16xf32> to vector<16x16xf32>
    %c0_31 = arith.constant 0 : index
    %c6_32 = arith.constant 6 : index
    %31 = vector.load %arg1[%c0_31, %c6_32] : memref<16x262xf32, #tpu.memory_space<vmem>>, vector<16x256xf32>
    %cst_33 = arith.constant dense<0.000000e+00> : vector<16x256xf32>
    %32 = tpu.matmul %30, %31, %cst_33 {dimension_numbers = #tpu.dot_dimension_numbers<[1], [0], [0], [1], [0, 0, 1, 1], [], []>} : vector<16x16xf32>, vector<16x256xf32>, vector<16x256xf32> -> vector<16x256xf32>
    %33 = arith.addf %28, %32 : vector<16x256xf32>
    %c0_34 = arith.constant 0 : index
    %c0_35 = arith.constant 0 : index
    %34 = vector.load %arg3[%c0_34, %c0_35] : memref<16x1xf32, #tpu.memory_space<vmem>>, vector<16x1xf32>
    %35 = vector.broadcast %34 : vector<16x1xf32> to vector<16x256xf32>
    %36 = arith.addf %33, %35 : vector<16x256xf32>
    %37 = math.tanh %36 : vector<16x256xf32>
    %cst_36 = arith.constant 0.000000e+00 : f32
    %38 = vector.broadcast %cst_36 : f32 to vector<16x3xf32>
    %c0_37 = arith.constant 0 : index
    %c0_38 = arith.constant 0 : index
    %39 = vector.load %arg8[%c0_37, %c0_38] : memref<16x262xf32, #tpu.memory_space<vmem>>, vector<16x3xf32>
    tpu.vector_store %arg8[%c0_37, %c0_38], %38 {strides = array<i32>} : memref<16x262xf32, #tpu.memory_space<vmem>>, vector<16x3xf32>,
    %c0_39 = arith.constant 0 : index
    %c259 = arith.constant 259 : index
    %40 = vector.load %arg8[%c0_39, %c259] : memref<16x262xf32, #tpu.memory_space<vmem>>, vector<16x3xf32>
    tpu.vector_store %arg8[%c0_39, %c259], %38 {strides = array<i32>} : memref<16x262xf32, #tpu.memory_space<vmem>>, vector<16x3xf32>,
    %c0_40 = arith.constant 0 : index
    %c3_41 = arith.constant 3 : index
    %41 = vector.load %arg8[%c0_40, %c3_41] : memref<16x262xf32, #tpu.memory_space<vmem>>, vector<16x256xf32>
    tpu.vector_store %arg8[%c0_40, %c3_41], %37 {strides = array<i32>} : memref<16x262xf32, #tpu.memory_space<vmem>>, vector<16x256xf32>,
    %c0_42 = arith.constant 0 : index
    %c0_43 = arith.constant 0 : index
    %42 = vector.load %arg8[%c0_42, %c0_43] : memref<16x262xf32, #tpu.memory_space<vmem>>, vector<16x256xf32>
    %c0_44 = arith.constant 0 : index
    %c0_45 = arith.constant 0 : index
    %43 = vector.load %arg4[%c0_44, %c0_45] : memref<16x7xf32, #tpu.memory_space<vmem>>, vector<16x1xf32>
    %44 = vector.broadcast %43 : vector<16x1xf32> to vector<16x256xf32>
    %45 = arith.mulf %42, %44 : vector<16x256xf32>
    %c0_46 = arith.constant 0 : index
    %c1_47 = arith.constant 1 : index
    %46 = vector.load %arg8[%c0_46, %c1_47] : memref<16x262xf32, #tpu.memory_space<vmem>>, vector<16x256xf32>
    %c0_48 = arith.constant 0 : index
    %c1_49 = arith.constant 1 : index
    %47 = vector.load %arg4[%c0_48, %c1_49] : memref<16x7xf32, #tpu.memory_space<vmem>>, vector<16x1xf32>
    %48 = vector.broadcast %47 : vector<16x1xf32> to vector<16x256xf32>
    %49 = arith.mulf %46, %48 : vector<16x256xf32>
    %50 = arith.addf %45, %49 : vector<16x256xf32>
    %c0_50 = arith.constant 0 : index
    %c2_51 = arith.constant 2 : index
    %51 = vector.load %arg8[%c0_50, %c2_51] : memref<16x262xf32, #tpu.memory_space<vmem>>, vector<16x256xf32>
    %c0_52 = arith.constant 0 : index
    %c2_53 = arith.constant 2 : index
    %52 = vector.load %arg4[%c0_52, %c2_53] : memref<16x7xf32, #tpu.memory_space<vmem>>, vector<16x1xf32>
    %53 = vector.broadcast %52 : vector<16x1xf32> to vector<16x256xf32>
    %54 = arith.mulf %51, %53 : vector<16x256xf32>
    %55 = arith.addf %50, %54 : vector<16x256xf32>
    %c0_54 = arith.constant 0 : index
    %c3_55 = arith.constant 3 : index
    %56 = vector.load %arg8[%c0_54, %c3_55] : memref<16x262xf32, #tpu.memory_space<vmem>>, vector<16x256xf32>
    %c0_56 = arith.constant 0 : index
    %c3_57 = arith.constant 3 : index
    %57 = vector.load %arg4[%c0_56, %c3_57] : memref<16x7xf32, #tpu.memory_space<vmem>>, vector<16x1xf32>
    %58 = vector.broadcast %57 : vector<16x1xf32> to vector<16x256xf32>
    %59 = arith.mulf %56, %58 : vector<16x256xf32>
    %60 = arith.addf %55, %59 : vector<16x256xf32>
    %c0_58 = arith.constant 0 : index
    %c4_59 = arith.constant 4 : index
    %61 = vector.load %arg8[%c0_58, %c4_59] : memref<16x262xf32, #tpu.memory_space<vmem>>, vector<16x256xf32>
    %c0_60 = arith.constant 0 : index
    %c4_61 = arith.constant 4 : index
    %62 = vector.load %arg4[%c0_60, %c4_61] : memref<16x7xf32, #tpu.memory_space<vmem>>, vector<16x1xf32>
    %63 = vector.broadcast %62 : vector<16x1xf32> to vector<16x256xf32>
    %64 = arith.mulf %61, %63 : vector<16x256xf32>
    %65 = arith.addf %60, %64 : vector<16x256xf32>
    %c0_62 = arith.constant 0 : index
    %c5_63 = arith.constant 5 : index
    %66 = vector.load %arg8[%c0_62, %c5_63] : memref<16x262xf32, #tpu.memory_space<vmem>>, vector<16x256xf32>
    %c0_64 = arith.constant 0 : index
    %c5_65 = arith.constant 5 : index
    %67 = vector.load %arg4[%c0_64, %c5_65] : memref<16x7xf32, #tpu.memory_space<vmem>>, vector<16x1xf32>
    %68 = vector.broadcast %67 : vector<16x1xf32> to vector<16x256xf32>
    %69 = arith.mulf %66, %68 : vector<16x256xf32>
    %70 = arith.addf %65, %69 : vector<16x256xf32>
    %c0_66 = arith.constant 0 : index
    %c6_67 = arith.constant 6 : index
    %71 = vector.load %arg8[%c0_66, %c6_67] : memref<16x262xf32, #tpu.memory_space<vmem>>, vector<16x256xf32>
    %c0_68 = arith.constant 0 : index
    %c6_69 = arith.constant 6 : index
    %72 = vector.load %arg4[%c0_68, %c6_69] : memref<16x7xf32, #tpu.memory_space<vmem>>, vector<16x1xf32>
    %73 = vector.broadcast %72 : vector<16x1xf32> to vector<16x256xf32>
    %74 = arith.mulf %71, %73 : vector<16x256xf32>
    %75 = arith.addf %70, %74 : vector<16x256xf32>
    %c0_70 = arith.constant 0 : index
    %c0_71 = arith.constant 0 : index
    %76 = vector.load %arg5[%c0_70, %c0_71] : memref<2x16xf32, #tpu.memory_space<vmem>>, vector<2x16xf32>
    %cst_72 = arith.constant dense<0.000000e+00> : vector<2x256xf32>
    %77 = tpu.matmul %76, %75, %cst_72 {dimension_numbers = #tpu.dot_dimension_numbers<[1], [0], [0], [1], [0, 0, 1, 1], [], []>} : vector<2x16xf32>, vector<16x256xf32>, vector<2x256xf32> -> vector<2x256xf32>
    %c0_73 = arith.constant 0 : index
    %78 = memref.load %arg6[%c0_73] : memref<1xf32, #tpu.memory_space<smem>>
    %79 = vector.broadcast %78 : f32 to vector<2x256xf32>
    %80 = arith.addf %77, %79 : vector<2x256xf32>
    %c0_74 = arith.constant 0 : index
    %c0_75 = arith.constant 0 : index
    %81 = vector.load %arg7[%c0_74, %c0_75] : memref<2x256xf32, #tpu.memory_space<vmem>>, vector<2x256xf32>
    tpu.vector_store %arg7[%c0_74, %c0_75], %80 {strides = array<i32>} : memref<2x256xf32, #tpu.memory_space<vmem>>, vector<2x256xf32>,
    return
  }
  func.func @transform_0(%arg0: i32) -> (i32, i32) {
    %c0_i32 = arith.constant 0 : i32
    %c0_i32_0 = arith.constant 0 : i32
    return %arg0, %c0_i32 : i32, i32
  }
  func.func @transform_1(%arg0: i32) -> (i32, i32, i32) {
    %c0_i32 = arith.constant 0 : i32
    %c0_i32_0 = arith.constant 0 : i32
    %c0_i32_1 = arith.constant 0 : i32
    %c0_i32_2 = arith.constant 0 : i32
    return %c0_i32, %c0_i32_0, %c0_i32_1 : i32, i32, i32
  }
  func.func @transform_2(%arg0: i32) -> (i32, i32) {
    %c0_i32 = arith.constant 0 : i32
    %c0_i32_0 = arith.constant 0 : i32
    %c0_i32_1 = arith.constant 0 : i32
    return %c0_i32, %c0_i32_0 : i32, i32
  }
  func.func @transform_3(%arg0: i32) -> (i32, i32) {
    %c0_i32 = arith.constant 0 : i32
    %c0_i32_0 = arith.constant 0 : i32
    %c0_i32_1 = arith.constant 0 : i32
    return %c0_i32, %c0_i32_0 : i32, i32
  }
  func.func @transform_4(%arg0: i32) -> (i32, i32) {
    %c0_i32 = arith.constant 0 : i32
    %c0_i32_0 = arith.constant 0 : i32
    %c0_i32_1 = arith.constant 0 : i32
    return %c0_i32, %c0_i32_0 : i32, i32
  }
  func.func @transform_5(%arg0: i32) -> i32 {
    %c0_i32 = arith.constant 0 : i32
    %c0_i32_0 = arith.constant 0 : i32
    return %c0_i32 : i32
  }
  func.func @transform_6(%arg0: i32) -> (i32, i32) {
    %c0_i32 = arith.constant 0 : i32
    %c0_i32_0 = arith.constant 0 : i32
    return %arg0, %c0_i32 : i32, i32
  }
}

</mosaic_0001>

<bundles_post_ra>
// kernel: tpu_custom_call.1
= control target key start
LH: loop header
LB: loop body
LE: loop exit
PB: predicated region body
PF: predicated region fallthrough
CT: control target
= control target key end

     0   :  { %12 = vsyncpa [#allocation5], 0  ;;  %s1917_s0 = inlined_call_operand.hbm [shape: f32[16,262], index: 0, kind: input, shape index: {}]   ;;  %s1918_s1 = inlined_call_operand.hbm [shape: f32[7,16,16], index: 1, kind: input, shape index: {}]   ;;  %s1919_s2 = inlined_call_operand.vmem [shape: f32[16,1], index: 2, kind: input, shape index: {}]   ;;  %s1920_s3 = inlined_call_operand.vmem [shape: f32[16,7], index: 3, kind: input, shape index: {}]   ;;  %s1921_s4 = inlined_call_operand.vmem [shape: f32[2,16], index: 4, kind: input, shape index: {}]   ;;  %s1922_s5 = inlined_call_operand.<no memory space> [shape: f32[1], index: 5, kind: input, shape index: {}]   ;;  %s1923_s6 = inlined_call_operand.hbm [shape: f32[2,256], index: 6, kind: output, shape index: {}]  }
   0x1   :  { %13 = vsyncpa [#allocation8], 0 }
   0x2   :  { %14 = vsyncpa [#allocation6], 0  ;;  %s1540_s21 = smov [#allocation4]   ;;  %s1468_s25 = scalar_lea.hbm %s1917_s0, 768 }
   0x3   :  { %s20_s22 = sshll.u32 %s1540_s21, 4  ;;  %p1469_p0 = scmp.ne.s32.totalorder %s1917_s0, %s1468_s25  ;;  %s21_s22 = int_to_ptr.vmem [resolvable:$true] %s20_s22 }
   0x4   :  { %p1472_p1 = scmp.lt.u32.totalorder %s1468_s25, %s1917_s0 }
   0x6   :  { %p1474_p2 = pnand %p1472_p1, %p1469_p0 }
   0x8   :  { %1477 = shalt.err (!%p1474_p2)
}
   0x9   :  { %s1478_s30 = scalar_lea.vmem %s21_s22, 768  ;;  %p1483_p4 = scmp.lt.s32.totalorder %s21_s22, %s21_s22 }
   0xa   :  { %p1479_p3 = scmp.ne.s32.totalorder %s21_s22, %s1478_s30  ;;  %p1484_p5 = scmp.lt.s32.totalorder %s1478_s30, %s1478_s30 }
   0xc   :  { %p1485_p6 = por %p1484_p5, %p1483_p4 }
   0xe   :  { %p1486_p7 = pnand %p1485_p6, %p1479_p3 }
  0x10   :  { %1489 = shalt.err (!%p1486_p7)
}
  0x11   :  { %s1541_s7 = smov 384   ;;  %s1542_s8 = smov 24  }
  0x12   :  { %26 = dma.hbm_to_vmem [thread:$0]  %s1917_s0, 768, %s21_s22, [#allocation5], %s1541_s7, %s1541_s7, %s1542_s8  }
  0x13   :  { %s1543_s11 = smov [#allocation7]   ;;  %s1490_s15 = scalar_lea.hbm %s1918_s1, 1792 }
  0x14   :  { %s32_s12 = sshll.u32 %s1543_s11, 4  ;;  %p1491_p8 = scmp.ne.s32.totalorder %s1918_s1, %s1490_s15  ;;  %s33_s12 = int_to_ptr.vmem [resolvable:$true] %s32_s12 }
  0x15   :  { %p1494_p9 = scmp.lt.u32.totalorder %s1490_s15, %s1918_s1 }
  0x17   :  { %p1496_p10 = pnand %p1494_p9, %p1491_p8 }
  0x19   :  { %1499 = shalt.err (!%p1496_p10)
}
  0x1a   :  { %s1500_s20 = scalar_lea.vmem %s33_s12, 1792  ;;  %p1505_p12 = scmp.lt.s32.totalorder %s33_s12, %s33_s12 }
  0x1b   :  { %p1501_p11 = scmp.ne.s32.totalorder %s33_s12, %s1500_s20  ;;  %p1506_p13 = scmp.lt.s32.totalorder %s1500_s20, %s1500_s20 }
  0x1d   :  { %p1507_p0 = por %p1506_p13, %p1505_p12 }
  0x1f   :  { %p1508_p1 = pnand %p1507_p0, %p1501_p11 }
  0x21   :  { %1511 = shalt.err (!%p1508_p1)
}
  0x22   :  { %s1544_s0 = smov 128   ;;  %s1545_s21 = smov 8  }
  0x23   :  { %38 = dma.hbm_to_vmem [thread:$0]  %s1918_s1, 1792, %s33_s12, [#allocation8], %s1544_s0, %s1544_s0, %s1545_s21  }
  0x24   :  { %1534 = dma.done.wait [#allocation5], 768  }
  0x25   :  { %1535 = vsyncadd [#allocation5], 4294966528 }
  0x26   :  { %1536 = dma.done.wait [#allocation8], 1792  }
  0x27   :  { %1537 = vsyncadd [#allocation8], 4294965504  ;;  %v1621_v0 = vld [vmem:[#allocation4 + $0x8] sm:$0xff]  ;;  %v62_v1 = vld [vmem:[#allocation4 + $0x10] sm:$0xff]  ;;  %s1546_s1 = smov 125   ;;  %v1547_v9 = vmov 0.0  }
  0x28   :  { %v1623_v2 = vld [vmem:[#allocation4] sm:$0xff]  ;;  %v1355_v3 = vpack.i.bf16 %v62_v1, %v1621_v0  ;;  %v1626_v4 = vld [vmem:[#allocation4 + $0x18] sm:$0xff]  ;;  %v63_v6 = vld [vmem:[#allocation4 + $0x28] sm:$0xff]  ;;  %463 = vmatprep.mubr.f32.mxu0 %v1547_v9  ;;  %162 = vmatprep.mubr.f32.mxu1 %v1547_v9  ;;  %s1548_s24 = smov 127   ;;  %s1549_s25 = smov 124   ;;  %v1553_v12 = vmov 0  }
  0x29   :  { %v1628_v5 = vld [vmem:[#allocation4 + $0x20] sm:$0xff]  ;;  %v1365_v7 = vpack.i.bf16 %v1626_v4, %v1623_v2  ;;  %v1283_v11 = vpack.c.bf16 %v1626_v4, %v1623_v2  ;;  %s1550_s26 = smov 123   ;;  %s1551_s27 = smov 126   ;;  %1445 = vset.pattern.permute.xlu0 %v1553_v12  ;;  %v813_v13 = vld [vmem:[%s1919_s2] sm:$0xff]  ;;  %1446 = vset.pattern.permute.xlu1 %v1553_v12  ;;  %v814_v14 = vld [vmem:[%s1919_s2 + $0x8] sm:$0xff]  ;;  %v1554_v17 = vmov 1  }
  0x2a   :  { %1356 = vrot.lane.b32.xlu0 %v1355_v3, %s1546_s1  ;;  %v1360_v8 = vpack.i.bf16 %v63_v6, %v1628_v5  ;;  %v1281_v10 = vpack.c.bf16 %v1628_v5, %v1621_v0  ;;  %s1552_s28 = smov 122   ;;  %v1668_v15 = vld [vmem:[%s1920_s3] sm:$0xff]  ;;  %v1673_v16 = vld [vmem:[%s1920_s3 + $0x8] sm:$0xff]  ;;  %v1555_v18 = vmov 3   ;;  %v1556_v19 = vmov 2   ;;  %v370_v48 = vld [vmem:[#allocation7 + $0x30] sm:$0xff] }
  0x2b   :  { %1366 = vrot.lane.b32.xlu1 %v1365_v7, %s1546_s1  ;;  %v1557_v20 = vmov 4   ;;  %v1558_v21 = vmov 5   ;;  %vm384_vm0 = vcmask 1022976   ;;  %vm82_vm1 = vcmask 1039360   ;;  %v371_v58 = vld [vmem:[#allocation7 + $0x38] sm:$0xff]  ;;  %v482_v2 = vld [vmem:[#allocation7 + $0x48] sm:$0xff] }
  0x2c   :  { %vm91_vm2 = vcmask 130048   ;;  %vm495_vm3 = vcmask 1014784   ;;  %vm606_vm4 = vcmask 1006592   ;;  %vm273_vm5 = vcmask 1031168   ;;  %s1560_s2 = smov 3   ;;  %s1561_s16 = smov [#allocation9]  }
  0x2d   :  { %vm717_vm6 = vcmask 998400   ;;  %vm833_vm7 = vcmask 23552   ;;  %vm836_vm8 = vcmask 48152   ;;  %vm859_vm9 = vcmask 1047576   ;;  %s1251_s17 = sshll.u32 %s1561_s16, 4  ;;  %s1252_s17 = int_to_ptr.vmem [resolvable:$true] %s1251_s17 }
  0x2e   :  { %1361 = vrot.lane.b32.xlu0 %v1360_v8, %s1546_s1  ;;  %834 = vst.msk [vmem:[#allocation2] sm:$0xff] %vm833_vm7, %v1547_v9  ;;  %835 = vst.msk [vmem:[#allocation2 + $0x18] sm:$0xff] %vm833_vm7, %v1547_v9  ;;  %s1512_s18 = scalar_lea.vmem %s1252_s17, 64  ;;  %p1517_p3 = scmp.lt.s32.totalorder %s1252_s17, %s1252_s17 }
  0x2f   :  { %1371 = vrot.lane.b32.xlu1 %v1355_v3, %s1548_s24  ;;  %837 = vst.msk [vmem:[#allocation2 + $0x10] sm:$0xff] %vm836_vm8, %v1547_v9  ;;  %838 = vst.msk [vmem:[#allocation2 + $0x28] sm:$0xff] %vm836_vm8, %v1547_v9  ;;  %p1513_p2 = scmp.ne.s32.totalorder %s1252_s17, %s1512_s18  ;;  %p1518_p4 = scmp.lt.s32.totalorder %s1512_s18, %s1512_s18 }
  0x31   :  { %p1519_p5 = por %p1518_p4, %p1517_p3 }
  0x32   :  { %1376 = vrot.lane.b32.xlu0 %v1360_v8, %s1548_s24 }
  0x33   :  { %1381 = vrot.lane.b32.xlu1 %v1355_v3, %s1549_s25  ;;  %p1520_p6 = pnand %p1519_p5, %p1513_p2 }
  0x36   :  { %1386 = vrot.lane.b32.xlu0 %v1360_v8, %s1549_s25 }
  0x37   :  { %1391 = vrot.lane.b32.xlu1 %v1365_v7, %s1548_s24 }
  0x3a   :  { %1396 = vrot.lane.b32.xlu0 %v1365_v7, %s1549_s25 }
  0x3b   :  { %1401 = vrot.lane.b32.xlu1 %v1355_v3, %s1550_s26 }
  0x3e   :  { %1406 = vrot.lane.b32.xlu0 %v1360_v8, %s1550_s26 }
  0x3f   :  { %1411 = vrot.lane.b32.xlu1 %v1365_v7, %s1550_s26 }
  0x42   :  { %1416 = vrot.lane.b32.xlu0 %v1355_v3, %s1551_s27 }
  0x43   :  { %1421 = vrot.lane.b32.xlu1 %v1360_v8, %s1551_s27 }
  0x46   :  { %1426 = vrot.lane.b32.xlu0 %v1355_v3, %s1552_s28 }
  0x47   :  { %1431 = vrot.lane.b32.xlu1 %v1360_v8, %s1552_s28 }
  0x4a   :  { %1436 = vrot.lane.b32.xlu0 %v1365_v7, %s1551_s27 }
  0x4b   :  { %1441 = vrot.lane.b32.xlu1 %v1365_v7, %s1552_s28 }
  0x4e   :  { %817 = vperm.xlu0 %1445, %v813_v13  }
  0x4f   :  { %822 = vperm.xlu1 %1446, %v814_v14  }
  0x52   :  { %1448 = vset.pattern.permute.xlu0 %v1554_v17 }
  0x53   :  { %1447 = vset.pattern.permute.xlu1 %v1554_v17  ;;  %897 = vperm.xlu0 %1448, %v1673_v16   ;;  %v60_v17 = vld [vmem:[#allocation7 + $0x10] sm:$0xff] }
  0x54   :  { %893 = vperm.xlu1 %1447, %v1668_v15  }
  0x57   :  { %1450 = vset.pattern.permute.xlu0 %v1555_v18 }
  0x58   :  { %1449 = vset.pattern.permute.xlu1 %v1556_v19  ;;  %981 = vperm.xlu0 %1450, %v1668_v15  }
  0x59   :  { %937 = vperm.xlu1 %1449, %v1668_v15  }
  0x5c   :  { %1453 = vset.pattern.permute.xlu0 %v1557_v20 }
  0x5d   :  { %941 = vperm.xlu1 %1449, %v1673_v16   ;;  %1029 = vperm.xlu0 %1453, %v1673_v16  }
  0x61   :  { %1451 = vset.pattern.permute.xlu1 %v1555_v18 }
  0x62   :  { %985 = vperm.xlu1 %1451, %v1673_v16  }
  0x66   :  { %1452 = vset.pattern.permute.xlu1 %v1557_v20 }
  0x67   :  { %1025 = vperm.xlu1 %1452, %v1668_v15  }
  0x6b   :  { %1454 = vset.pattern.permute.xlu1 %v1558_v21 }
  0x6c   :  { %1069 = vperm.xlu1 %1454, %v1668_v15  }
  0x70   :  { %1073 = vperm.xlu1 %1454, %v1673_v16  }
  0x9c   :  { %v1357_v22 = vpop.permute.xlu0 %1356 }
  0x9d   :  { %v1367_v23 = vpop.permute.xlu1 %1366  ;;  %v1359_v24 = vunpack.i.h.bf16 %v1357_v22  ;;  %v1358_v25 = vunpack.i.l.bf16 %v1357_v22 }
  0x9e   :  { %v1368_v26 = vunpack.i.l.bf16 %v1367_v23  ;;  %v1369_v28 = vunpack.i.h.bf16 %v1367_v23 }
  0x9f   :  { %v386_v32 = vsel %vm384_vm0, %v1358_v25, %v1359_v24 }
  0xa0   :  { %v1362_v27 = vpop.permute.xlu0 %1361  ;;  %v385_v33 = vsel %vm384_vm0, %v1368_v26, %v1358_v25  ;;  %v481_v25 = vld [vmem:[#allocation7 + $0x40] sm:$0xff] }
  0xa1   :  { %v1364_v29 = vunpack.i.h.bf16 %v1362_v27  ;;  %v1363_v30 = vunpack.i.l.bf16 %v1362_v27  ;;  %v1372_v31 = vpop.permute.xlu1 %1371 }
  0xa2   :  { %v1374_v34 = vunpack.i.h.bf16 %v1372_v31  ;;  %v1373_v35 = vunpack.i.l.bf16 %v1372_v31 }
  0xa3   :  { %v388_v36 = vsel %vm384_vm0, %v1363_v30, %v1364_v29  ;;  %v387_v37 = vsel %vm384_vm0, %v1369_v28, %v1363_v30  ;;  %v61_v29 = vld [vmem:[#allocation7 + $0x18] sm:$0xff] }
  0xa4   :  { %v1377_v38 = vpop.permute.xlu0 %1376  ;;  %v1289_v39 = vpack.c.bf16 %v388_v36, %v386_v32  ;;  %v1291_v40 = vpack.c.bf16 %v387_v37, %v385_v33  ;;  %v84_v46 = vsel %vm82_vm1, %v1373_v35, %v1374_v34  ;;  %v53_v37 = vld [vmem:[#allocation7] sm:$0xff] }
  0xa5   :  { %v1379_v41 = vunpack.i.h.bf16 %v1377_v38  ;;  %v1378_v42 = vunpack.i.l.bf16 %v1377_v38  ;;  %v1382_v43 = vpop.permute.xlu1 %1381 }
  0xa6   :  { %1290 = vmatprep.subr.bf16.mxu0 %v1289_v39  ;;  %v1384_v44 = vunpack.i.h.bf16 %v1382_v43  ;;  %v1383_v45 = vunpack.i.l.bf16 %v1382_v43 }
  0xa7   :  { %1292 = vmatpush1.bf16.msra.mxu0 %v1291_v40  ;;  %v86_v47 = vsel %vm82_vm1, %v1378_v42, %v1379_v41 }
  0xa8   :  { %v1387_v49 = vpop.permute.xlu0 %1386  ;;  %v1277_v50 = vpack.c.bf16 %v86_v47, %v84_v46  ;;  %v497_v56 = vsel %vm495_vm3, %v1383_v45, %v1384_v44  ;;  %v592_v44 = vld [vmem:[#allocation7 + $0x50] sm:$0xff] }
  0xa9   :  { %v1389_v51 = vunpack.i.h.bf16 %v1387_v49  ;;  %v1388_v52 = vunpack.i.l.bf16 %v1387_v49  ;;  %v1392_v53 = vpop.permute.xlu1 %1391 }
  0xaa   :  { %v1394_v54 = vunpack.i.h.bf16 %v1392_v53  ;;  %v1393_v55 = vunpack.i.l.bf16 %v1392_v53  ;;  %1278 = vmatprep.subr.bf16.mxu1 %v1277_v50  ;;  %1267 = vmatmul.mubr.msk.f32.vlgmr.msra.gmra.mrb[0].mxu0 %vm91_vm2, %v370_v48  ;;  %v54_v48 = vld [vmem:[#allocation7 + $0x8] sm:$0xff] }
  0xab   :  { %v499_v57 = vsel %vm495_vm3, %v1388_v52, %v1389_v51  ;;  %469 = vmatprep.mubr.f32.mxu0 %v1547_v9 }
  0xac   :  { %v1397_v59 = vpop.permute.xlu0 %1396  ;;  %v83_v60 = vsel %vm82_vm1, %v1393_v55, %v1373_v35  ;;  %v85_v61 = vsel %vm82_vm1, %v1394_v54, %v1378_v42  ;;  %v1293_v62 = vpack.c.bf16 %v499_v57, %v497_v56  ;;  %v593_v55 = vld [vmem:[#allocation7 + $0x58] sm:$0xff] }
  0xad   :  { %v1399_v63 = vunpack.i.h.bf16 %v1397_v59  ;;  %v1398_v1 = vunpack.i.l.bf16 %v1397_v59  ;;  %v1402_v3 = vpop.permute.xlu1 %1401  ;;  %v1279_v6 = vpack.c.bf16 %v85_v61, %v83_v60 }
  0xae   :  { %1294 = vmatprep.subr.bf16.mxu0 %v1293_v62  ;;  %1268 = vmatmul.mubr.msk.f32.gmra.mrb[2].mxu0 %vm91_vm2, %v371_v58  ;;  %v1404_v13 = vunpack.i.h.bf16 %v1402_v3  ;;  %v1403_v14 = vunpack.i.l.bf16 %v1402_v3  ;;  %v259_v62 = vld [vmem:[#allocation7 + $0x20] sm:$0xff]  ;;  %v704_v3 = vld [vmem:[#allocation7 + $0x68] sm:$0xff] }
  0xaf   :  { %v498_v7 = vsel %vm495_vm3, %v1399_v63, %v1388_v52  ;;  %v496_v8 = vsel %vm495_vm3, %v1398_v1, %v1383_v45  ;;  %1280 = vmatpush1.bf16.msra.mxu1 %v1279_v6  ;;  %574 = vmatprep.mubr.f32.mxu0 %v1547_v9  ;;  %v703_v63 = vld [vmem:[#allocation7 + $0x60] sm:$0xff]  ;;  %v260_v1 = vld [vmem:[#allocation7 + $0x28] sm:$0xff]  ;;  %v1559_v6 = vmov 6  }
  0xb0   :  { %v1295_v18 = vpack.c.bf16 %v498_v7, %v496_v8  ;;  %v1407_v19 = vpop.permute.xlu0 %1406  ;;  %1282 = vmatprep.subr.bf16.mxu1 %v1281_v10  ;;  %v608_v26 = vsel %vm606_vm4, %v1403_v14, %v1404_v13  ;;  %1456 = vset.pattern.permute.xlu1 %v1559_v6 }
  0xb1   :  { %v1409_v20 = vunpack.i.h.bf16 %v1407_v19  ;;  %v1408_v21 = vunpack.i.l.bf16 %v1407_v19  ;;  %v1412_v22 = vpop.permute.xlu1 %1411  ;;  %1455 = vset.pattern.permute.xlu0 %v1559_v6 }
  0xb2   :  { %v1414_v23 = vunpack.i.h.bf16 %v1412_v22  ;;  %v1413_v24 = vunpack.i.l.bf16 %v1412_v22  ;;  %1296 = vmatpush1.bf16.msra.mxu0 %v1295_v18  ;;  %1261 = vmatmul.mubr.msk.f32.vlgmr.msra.gmra.mrb[0].mxu1 %vm91_vm2, %v60_v17 }
  0xb3   :  { %v610_v27 = vsel %vm606_vm4, %v1408_v21, %v1409_v20  ;;  %168 = vmatprep.mubr.f32.mxu1 %v1547_v9  ;;  %1284 = vmatpush1.bf16.msra.mxu1 %v1283_v11 }
  0xb4   :  { %v609_v0 = vsel %vm606_vm4, %v1414_v23, %v1408_v21  ;;  %v607_v5 = vsel %vm606_vm4, %v1413_v24, %v1403_v14  ;;  %v1417_v10 = vpop.permute.xlu0 %1416  ;;  %v1297_v28 = vpack.c.bf16 %v610_v27, %v608_v26 }
  0xb5   :  { %v1299_v30 = vpack.c.bf16 %v609_v0, %v607_v5  ;;  %v1419_v31 = vunpack.i.h.bf16 %v1417_v10  ;;  %v1418_v32 = vunpack.i.l.bf16 %v1417_v10  ;;  %v1422_v33 = vpop.permute.xlu1 %1421  ;;  %1269 = vmatmul.mubr.msk.f32.vlgmr.msra.gmra.mrb[0].mxu0 %vm91_vm2, %v481_v25 }
  0xb6   :  { %v1424_v34 = vunpack.i.h.bf16 %v1422_v33  ;;  %v1423_v35 = vunpack.i.l.bf16 %v1422_v33  ;;  %1298 = vmatprep.subr.bf16.mxu0 %v1297_v28  ;;  %580 = vmatprep.mubr.f32.mxu0 %v1547_v9 }
  0xb7   :  { %1300 = vmatpush1.bf16.msra.mxu0 %v1299_v30  ;;  %1262 = vmatmul.mubr.msk.f32.gmra.mrb[2].mxu1 %vm91_vm2, %v61_v29  ;;  %v275_v4 = vsel %vm273_vm5, %v1418_v32, %v1419_v31 }
  0xb8   :  { %v1427_v11 = vpop.permute.xlu0 %1426  ;;  %v277_v36 = vsel %vm273_vm5, %v1423_v35, %v1424_v34  ;;  %245 = vmatprep.mubr.f32.mxu1 %v1547_v9 }
  0xb9   :  { %v1429_v38 = vunpack.i.h.bf16 %v1427_v11  ;;  %v1428_v39 = vunpack.i.l.bf16 %v1427_v11  ;;  %v1432_v40 = vpop.permute.xlu1 %1431  ;;  %1270 = vmatmul.mubr.msk.f32.gmra.mrb[2].mxu0 %vm91_vm2, %v482_v2  ;;  %v1285_v41 = vpack.c.bf16 %v277_v36, %v275_v4 }
  0xba   :  { %v1434_v42 = vunpack.i.h.bf16 %v1432_v40  ;;  %v1433_v43 = vunpack.i.l.bf16 %v1432_v40  ;;  %685 = vmatprep.mubr.f32.mxu0 %v1547_v9 }
  0xbb   :  { %1286 = vmatprep.subr.bf16.mxu1 %v1285_v41  ;;  %1263 = vmatmul.mubr.msk.f32.vlgmr.msra.gmra.mrb[0].mxu1 %vm91_vm2, %v53_v37  ;;  %v719_v45 = vsel %vm717_vm6, %v1428_v39, %v1429_v38 }
  0xbc   :  { %v1437_v46 = vpop.permute.xlu0 %1436  ;;  %v721_v47 = vsel %vm717_vm6, %v1433_v43, %v1434_v42  ;;  %251 = vmatprep.mubr.f32.mxu1 %v1547_v9 }
  0xbd   :  { %v1439_v49 = vunpack.i.h.bf16 %v1437_v46  ;;  %v1438_v50 = vunpack.i.l.bf16 %v1437_v46  ;;  %v1442_v51 = vpop.permute.xlu1 %1441  ;;  %1271 = vmatmul.mubr.msk.f32.vlgmr.msra.gmra.mrb[0].mxu0 %vm91_vm2, %v592_v44  ;;  %v1301_v52 = vpack.c.bf16 %v721_v47, %v719_v45 }
  0xbe   :  { %v1444_v53 = vunpack.i.h.bf16 %v1442_v51  ;;  %v1443_v54 = vunpack.i.l.bf16 %v1442_v51  ;;  %691 = vmatprep.mubr.f32.mxu0 %v1547_v9 }
  0xbf   :  { %v274_v56 = vsel %vm273_vm5, %v1438_v50, %v1418_v32  ;;  %v276_v57 = vsel %vm273_vm5, %v1439_v49, %v1423_v35  ;;  %1302 = vmatprep.subr.bf16.mxu0 %v1301_v52  ;;  %1264 = vmatmul.mubr.msk.f32.gmra.mrb[2].mxu1 %vm91_vm2, %v54_v48 }
  0xc0   :  { %v1287_v58 = vpack.c.bf16 %v276_v57, %v274_v56  ;;  %v718_v59 = vsel %vm717_vm6, %v1443_v54, %v1428_v39  ;;  %v720_v60 = vsel %vm717_vm6, %v1444_v53, %v1433_v43  ;;  %352 = vmatprep.mubr.f32.mxu1 %v1547_v9 }
  0xc1   :  { %v1303_v61 = vpack.c.bf16 %v720_v60, %v718_v59  ;;  %1272 = vmatmul.mubr.msk.f32.gmra.mrb[2].mxu0 %vm91_vm2, %v593_v55 }
  0xc2   :  { %1288 = vmatpush1.bf16.msra.mxu1 %v1287_v58  ;;  %796 = vmatprep.mubr.f32.mxu0 %v1547_v9 }
  0xc3   :  { %1304 = vmatpush1.bf16.msra.mxu0 %v1303_v61 }
  0xc5   :  { %1265 = vmatmul.mubr.msk.f32.vlgmr.msra.gmra.mrb[0].mxu1 %vm91_vm2, %v259_v62 }
  0xc6   :  { %1273 = vmatmul.mubr.msk.f32.vlgmr.msra.gmra.mrb[0].mxu0 %vm91_vm2, %v703_v63  ;;  %358 = vmatprep.mubr.f32.mxu1 %v1547_v9 }
  0xc7   :  { %802 = vmatprep.mubr.f32.mxu0 %v1547_v9 }
  0xc9   :  { %1266 = vmatmul.mubr.msk.f32.gmra.mrb[2].mxu1 %vm91_vm2, %v260_v1 }
  0xca   :  { %1274 = vmatmul.mubr.msk.f32.gmra.mrb[2].mxu0 %vm91_vm2, %v704_v3  ;;  %1226 = vmatprep.mubr.f32.mxu1 %v1547_v9 }
  0xcd   :  { %v818_v8 = vpop.permute.xlu0 %817 }
  0xce   :  { %v823_v22 = vpop.permute.xlu1 %822 }
  0xd2   :  { %v1758_v2 = vpop.permute.xlu0 %897 }
  0xd3   :  { %v894_v9 = vpop.permute.xlu1 %893 }
  0xd7   :  { %v982_v11 = vpop.permute.xlu0 %981 }
  0xd8   :  { %v938_v32 = vpop.permute.xlu1 %937 }
  0xdc   :  { %v1754_v33 = vpop.permute.xlu1 %941  ;;  %v1762_v37 = vpop.permute.xlu0 %1029 }
  0xe1   :  { %v1756_v34 = vpop.permute.xlu1 %985 }
  0xe6   :  { %v1026_v35 = vpop.permute.xlu1 %1025 }
  0xeb   :  { %v1070_v4 = vpop.permute.xlu1 %1069 }
  0xef   :  { %v1760_v36 = vpop.permute.xlu1 %1073 }
 0x198   :  { %v354_v7 = vpop.f32.mrb[0].mxu1 }
 0x199   :  { %v798_v13 = vpop.f32.mrb[0].mxu0  ;;  %v356_v14 = vpop.f32.mrb[1].mxu1 }
 0x19a   :  { %v1309_v17 = vadd.f32 %v798_v13, %v354_v7  ;;  %v800_v18 = vpop.f32.mrb[1].mxu0 }
 0x19b   :  { %v1310_v19 = vadd.f32 %v800_v18, %v356_v14 }
 0x19c   :  { %v825_v20 = vadd.f32 %v1309_v17, %v818_v8  ;;  %v360_v21 = vpop.f32.mrb[2].mxu1 }
 0x19d   :  { %v826_v23 = vadd.f32 %v1310_v19, %v818_v8  ;;  %v804_v24 = vpop.f32.mrb[2].mxu0  ;;  %v362_v25 = vpop.f32.mrb[3].mxu1 }
 0x19e   :  { %1460 = vtanh.f32 %v825_v20  ;;  %v1311_v26 = vadd.f32 %v804_v24, %v360_v21  ;;  %v806_v27 = vpop.f32.mrb[3].mxu0 }
 0x19f   :  { %1462 = vtanh.f32 %v826_v23  ;;  %v1312_v0 = vadd.f32 %v806_v27, %v362_v25 }
 0x1a0   :  { %v827_v5 = vadd.f32 %v1311_v26, %v823_v22 }
 0x1a1   :  { %v828_v10 = vadd.f32 %v1312_v0, %v823_v22 }
 0x1a2   :  { %1464 = vtanh.f32 %v827_v5 }
 0x1a3   :  { %1466 = vtanh.f32 %v828_v10 }
 0x1a8   :  { %v1461_v28 = vpop.eup %1460 }
 0x1a9   :  { %v1463_v29 = vpop.eup %1462  ;;  %843 = vrot.lane.b32.xlu1 %v1461_v28, %s1560_s2 }
 0x1aa   :  { %845 = vrot.lane.b32.xlu0 %v1463_v29, %s1560_s2 }
 0x1ac   :  { %v1465_v30 = vpop.eup %1464 }
 0x1ad   :  { %v1467_v31 = vpop.eup %1466  ;;  %847 = vrot.lane.b32.xlu1 %v1465_v30, %s1560_s2 }
 0x1ae   :  { %849 = vrot.lane.b32.xlu0 %v1467_v31, %s1560_s2 }
 0x1b1   :  { %1117 = vperm.xlu1 %1456, %v1673_v16  }
 0x1b2   :  { %1113 = vperm.xlu0 %1455, %v1668_v15  }
 0x1b5   :  { %1457 = vset.pattern.permute.xlu1 %v1553_v12 }
 0x1b6   :  { %874 = vperm.xlu1 %1457, %v1668_v15   ;;  %1458 = vset.pattern.permute.xlu0 %v1553_v12 }
 0x1b7   :  { %879 = vperm.xlu0 %1458, %v1673_v16  }
 0x1bb   :  { %1459 = vset.pattern.permute.xlu0 %v1559_v6 }
 0x21b   :  { %v844_v12 = vpop.permute.xlu1 %843 }
 0x21c   :  { %860 = vst.msk [vmem:[#allocation2] sm:$0xff] %vm859_vm9, %v844_v12  ;;  %v846_v15 = vpop.permute.xlu0 %845 }
 0x21d   :  { %v1765_v16 = vsel %vm833_vm7, %v844_v12, %v846_v15  ;;  %862 = vst.msk [vmem:[#allocation2 + $0x10] sm:$0xff] %vm833_vm7, %v846_v15 }
 0x21e   :  { %v945_v57 = vmul.f32 %v938_v32, %v1765_v16  ;;  %v989_v59 = vmul.f32 %v982_v11, %v1765_v16  ;;  %v901_v60 = vmul.f32 %v894_v9, %v1765_v16  ;;  %v1033_v62 = vmul.f32 %v1026_v35, %v1765_v16 }
 0x21f   :  { %v848_v38 = vpop.permute.xlu1 %847  ;;  %v1077_v1 = vmul.f32 %v1070_v4, %v1765_v16 }
 0x220   :  { %863 = vst.msk [vmem:[#allocation2 + $0x18] sm:$0xff] %vm859_vm9, %v848_v38  ;;  %v850_v39 = vpop.permute.xlu0 %849 }
 0x221   :  { %v1769_v40 = vsel %vm833_vm7, %v848_v38, %v850_v39  ;;  %865 = vst.msk [vmem:[#allocation2 + $0x28] sm:$0xff] %vm833_vm7, %v850_v39 }
 0x222   :  { %v904_v8 = vmul.f32 %v1758_v2, %v1769_v40  ;;  %v948_v14 = vmul.f32 %v1754_v33, %v1769_v40  ;;  %v992_v19 = vmul.f32 %v1756_v34, %v1769_v40  ;;  %v1036_v21 = vmul.f32 %v1762_v37, %v1769_v40 }
 0x223   :  { %v1772_v41 = vld [vmem:[#allocation2] sm:$0xff]  ;;  %v1080_v23 = vmul.f32 %v1760_v36, %v1769_v40 }
 0x224   :  { %v900_v42 = vmul.f32 %v894_v9, %v1772_v41  ;;  %v888_v43 = vld [vmem:[#allocation2 + $0x10] sm:$0xff]  ;;  %v944_v45 = vmul.f32 %v938_v32, %v1772_v41  ;;  %v988_v47 = vmul.f32 %v982_v11, %v1772_v41  ;;  %v1032_v50 = vmul.f32 %v1026_v35, %v1772_v41 }
 0x225   :  { %v902_v44 = vmul.f32 %v894_v9, %v888_v43  ;;  %v946_v46 = vmul.f32 %v938_v32, %v888_v43  ;;  %v990_v48 = vmul.f32 %v982_v11, %v888_v43  ;;  %v1034_v51 = vmul.f32 %v1026_v35, %v888_v43 }
 0x226   :  { %912 = vrot.lane.b32.xlu0 %v900_v42, %s1548_s24  ;;  %v1076_v52 = vmul.f32 %v1070_v4, %v1772_v41  ;;  %v1078_v54 = vmul.f32 %v1070_v4, %v888_v43 }
 0x227   :  { %916 = vrot.lane.b32.xlu1 %v902_v44, %s1548_s24  ;;  %v1802_v61 = vld [vmem:[#allocation2 + $0x18] sm:$0xff] }
 0x228   :  { %v903_v63 = vmul.f32 %v1758_v2, %v1802_v61  ;;  %v947_v3 = vmul.f32 %v1754_v33, %v1802_v61  ;;  %v991_v7 = vmul.f32 %v1756_v34, %v1802_v61  ;;  %v1035_v13 = vmul.f32 %v1762_v37, %v1802_v61  ;;  %v891_v18 = vld [vmem:[#allocation2 + $0x28] sm:$0xff] }
 0x229   :  { %v1079_v17 = vmul.f32 %v1760_v36, %v1802_v61  ;;  %v905_v20 = vmul.f32 %v1758_v2, %v891_v18  ;;  %v949_v22 = vmul.f32 %v1754_v33, %v891_v18  ;;  %v993_v24 = vmul.f32 %v1756_v34, %v891_v18 }
 0x22a   :  { %956 = vrot.lane.b32.xlu0 %v944_v45, %s1551_s27  ;;  %v1037_v26 = vmul.f32 %v1762_v37, %v891_v18  ;;  %v1081_v0 = vmul.f32 %v1760_v36, %v891_v18 }
 0x22b   :  { %960 = vrot.lane.b32.xlu1 %v946_v46, %s1551_s27 }
 0x22e   :  { %1000 = vrot.lane.b32.xlu0 %v988_v47, %s1546_s1 }
 0x22f   :  { %1004 = vrot.lane.b32.xlu1 %v990_v48, %s1546_s1 }
 0x230   :  { %v1783_v49 = vpop.permute.xlu1 %1117 }
 0x231   :  { %v1114_v55 = vpop.permute.xlu0 %1113  ;;  %v1124_v25 = vmul.f32 %v1783_v49, %v1769_v40  ;;  %v1125_v5 = vmul.f32 %v1783_v49, %v891_v18  ;;  %v1123_v10 = vmul.f32 %v1783_v49, %v1802_v61 }
 0x232   :  { %1044 = vrot.lane.b32.xlu0 %v1032_v50, %s1549_s25  ;;  %v1122_v58 = vmul.f32 %v1114_v55, %v888_v43  ;;  %v1121_v6 = vmul.f32 %v1114_v55, %v1765_v16  ;;  %v1120_v27 = vmul.f32 %v1114_v55, %v1772_v41 }
 0x233   :  { %1048 = vrot.lane.b32.xlu1 %v1034_v51, %s1549_s25 }
 0x235   :  { %v1789_v53 = vpop.permute.xlu1 %874 }
 0x236   :  { %v1793_v56 = vmul.f32 %v1772_v41, %v1789_v53  ;;  %1088 = vrot.lane.b32.xlu0 %v1076_v52, %s1550_s26  ;;  %v880_v28 = vpop.permute.xlu0 %879  ;;  %v883_v50 = vmul.f32 %v1789_v53, %v1765_v16 }
 0x237   :  { %1092 = vrot.lane.b32.xlu1 %v1078_v54, %s1550_s26 }
 0x23a   :  { %958 = vrot.lane.b32.xlu0 %v945_v57, %s1551_s27 }
 0x23b   :  { %1136 = vrot.lane.b32.xlu1 %v1122_v58, %s1552_s28 }
 0x23e   :  { %1002 = vrot.lane.b32.xlu0 %v989_v59, %s1546_s1 }
 0x23f   :  { %914 = vrot.lane.b32.xlu1 %v901_v60, %s1548_s24 }
 0x242   :  { %1046 = vrot.lane.b32.xlu0 %v1033_v62, %s1549_s25 }
 0x243   :  { %918 = vrot.lane.b32.xlu1 %v903_v63, %s1548_s24 }
 0x246   :  { %1090 = vrot.lane.b32.xlu0 %v1077_v1, %s1550_s26 }
 0x247   :  { %962 = vrot.lane.b32.xlu1 %v947_v3, %s1551_s27 }
 0x24a   :  { %1134 = vrot.lane.b32.xlu0 %v1121_v6, %s1552_s28  ;;  %v885_v6 = vmul.f32 %v880_v28, %v1769_v40 }
 0x24b   :  { %1006 = vrot.lane.b32.xlu1 %v991_v7, %s1546_s1 }
 0x24e   :  { %920 = vrot.lane.b32.xlu0 %v904_v8, %s1548_s24 }
 0x24f   :  { %1050 = vrot.lane.b32.xlu1 %v1035_v13, %s1549_s25 }
 0x252   :  { %964 = vrot.lane.b32.xlu0 %v948_v14, %s1551_s27 }
 0x253   :  { %1094 = vrot.lane.b32.xlu1 %v1079_v17, %s1550_s26 }
 0x256   :  { %1008 = vrot.lane.b32.xlu0 %v992_v19, %s1546_s1  ;;  %v884_v19 = vmul.f32 %v1802_v61, %v880_v28 }
 0x257   :  { %922 = vrot.lane.b32.xlu1 %v905_v20, %s1548_s24 }
 0x25a   :  { %1052 = vrot.lane.b32.xlu0 %v1036_v21, %s1549_s25 }
 0x25b   :  { %966 = vrot.lane.b32.xlu1 %v949_v22, %s1551_s27 }
 0x25e   :  { %1096 = vrot.lane.b32.xlu0 %v1080_v23, %s1550_s26 }
 0x25f   :  { %1010 = vrot.lane.b32.xlu1 %v993_v24, %s1546_s1 }
 0x262   :  { %1140 = vrot.lane.b32.xlu0 %v1124_v25, %s1552_s28 }
 0x263   :  { %1054 = vrot.lane.b32.xlu1 %v1037_v26, %s1549_s25 }
 0x266   :  { %1132 = vrot.lane.b32.xlu0 %v1120_v27, %s1552_s28 }
 0x267   :  { %1098 = vrot.lane.b32.xlu1 %v1081_v0, %s1550_s26 }
 0x26b   :  { %1142 = vrot.lane.b32.xlu1 %v1125_v5, %s1552_s28 }
 0x26f   :  { %1138 = vrot.lane.b32.xlu1 %v1123_v10, %s1552_s28 }
 0x298   :  { %v913_v29 = vpop.permute.xlu0 %912 }
 0x299   :  { %v917_v30 = vpop.permute.xlu1 %916 }
 0x29c   :  { %v957_v31 = vpop.permute.xlu0 %956 }
 0x29d   :  { %v961_v9 = vpop.permute.xlu1 %960 }
 0x2a0   :  { %v1001_v32 = vpop.permute.xlu0 %1000 }
 0x2a1   :  { %v1005_v33 = vpop.permute.xlu1 %1004 }
 0x2a4   :  { %v1045_v34 = vpop.permute.xlu0 %1044 }
 0x2a5   :  { %v1049_v35 = vpop.permute.xlu1 %1048 }
 0x2a8   :  { %v1862_v2 = vpop.permute.xlu0 %1088 }
 0x2a9   :  { %v1093_v4 = vpop.permute.xlu1 %1092 }
 0x2ac   :  { %v959_v11 = vpop.permute.xlu0 %958 }
 0x2ad   :  { %v1137_v36 = vpop.permute.xlu1 %1136  ;;  %v969_v57 = vsel %vm273_vm5, %v959_v11, %v961_v9  ;;  %v968_v53 = vsel %vm273_vm5, %v957_v31, %v959_v11 }
 0x2b0   :  { %v1003_v37 = vpop.permute.xlu0 %1002 }
 0x2b1   :  { %v915_v12 = vpop.permute.xlu1 %914  ;;  %v1013_v1 = vsel %vm384_vm0, %v1003_v37, %v1005_v33  ;;  %v1012_v40 = vsel %vm384_vm0, %v1001_v32, %v1003_v37 }
 0x2b2   :  { %v925_v48 = vsel %vm82_vm1, %v915_v12, %v917_v30  ;;  %v924_v58 = vsel %vm82_vm1, %v913_v29, %v915_v12 }
 0x2b3   :  { %v933_v52 = vadd.f32 %v925_v48, %v883_v50  ;;  %v932_v60 = vadd.f32 %v924_v58, %v1793_v56 }
 0x2b4   :  { %v1047_v15 = vpop.permute.xlu0 %1046 }
 0x2b5   :  { %v919_v38 = vpop.permute.xlu1 %918  ;;  %v977_v59 = vadd.f32 %v969_v57, %v933_v52  ;;  %v976_v8 = vadd.f32 %v968_v53, %v932_v60  ;;  %v1057_v17 = vsel %vm495_vm3, %v1047_v15, %v1049_v35  ;;  %v1056_v31 = vsel %vm495_vm3, %v1045_v34, %v1047_v15 }
 0x2b7   :  { %v1021_v16 = vadd.f32 %v1013_v1, %v977_v59  ;;  %v1020_v26 = vadd.f32 %v1012_v40, %v976_v8 }
 0x2b8   :  { %v1091_v39 = vpop.permute.xlu0 %1090 }
 0x2b9   :  { %v963_v41 = vpop.permute.xlu1 %962  ;;  %v1065_v20 = vadd.f32 %v1057_v17, %v1021_v16  ;;  %v1101_v23 = vsel %vm606_vm4, %v1091_v39, %v1093_v4  ;;  %v1064_v33 = vadd.f32 %v1056_v31, %v1020_v26  ;;  %v1100_v12 = vsel %vm606_vm4, %v1862_v2, %v1091_v39  ;;  %v1156_v39 = vld [vmem:[%s1921_s4] sm:$0x3] }
 0x2bb   :  { %v1109_v61 = vadd.f32 %v1101_v23, %v1065_v20  ;;  %v1108_v15 = vadd.f32 %v1100_v12, %v1064_v33 }
 0x2bc   :  { %v1864_v42 = vpop.permute.xlu0 %1134 }
 0x2bd   :  { %v1007_v43 = vpop.permute.xlu1 %1006  ;;  %v1145_v9 = vsel %vm717_vm6, %v1864_v42, %v1137_v36 }
 0x2c0   :  { %v921_v44 = vpop.permute.xlu0 %920 }
 0x2c1   :  { %v1051_v45 = vpop.permute.xlu1 %1050  ;;  %v926_v56 = vsel %vm82_vm1, %v919_v38, %v921_v44 }
 0x2c2   :  { %v934_v27 = vadd.f32 %v926_v56, %v884_v19 }
 0x2c4   :  { %v965_v46 = vpop.permute.xlu0 %964 }
 0x2c5   :  { %v1095_v47 = vpop.permute.xlu1 %1094  ;;  %v970_v24 = vsel %vm273_vm5, %v963_v41, %v965_v46 }
 0x2c6   :  { %v978_v28 = vadd.f32 %v970_v24, %v934_v27 }
 0x2c8   :  { %v1009_v49 = vpop.permute.xlu0 %1008 }
 0x2c9   :  { %v923_v51 = vpop.permute.xlu1 %922  ;;  %v1014_v10 = vsel %vm384_vm0, %v1007_v43, %v1009_v49  ;;  %v1153_v43 = vadd.f32 %v1145_v9, %v1109_v61 }
 0x2ca   :  { %v927_v3 = vsel %vm82_vm1, %v921_v44, %v923_v51  ;;  %v1022_v35 = vadd.f32 %v1014_v10, %v978_v28 }
 0x2cb   :  { %v935_v13 = vadd.f32 %v927_v3, %v885_v6 }
 0x2cc   :  { %v1053_v54 = vpop.permute.xlu0 %1052 }
 0x2cd   :  { %v967_v55 = vpop.permute.xlu1 %966  ;;  %v1058_v32 = vsel %vm495_vm3, %v1051_v45, %v1053_v54 }
 0x2ce   :  { %v971_v7 = vsel %vm273_vm5, %v965_v46, %v967_v55  ;;  %v1066_v44 = vadd.f32 %v1058_v32, %v1022_v35 }
 0x2cf   :  { %v979_v21 = vadd.f32 %v971_v7, %v935_v13 }
 0x2d0   :  { %v1097_v62 = vpop.permute.xlu0 %1096 }
 0x2d1   :  { %v1011_v63 = vpop.permute.xlu1 %1010  ;;  %v1102_v38 = vsel %vm606_vm4, %v1095_v47, %v1097_v62 }
 0x2d2   :  { %v1015_v18 = vsel %vm384_vm0, %v1009_v49, %v1011_v63  ;;  %v1110_v45 = vadd.f32 %v1102_v38, %v1066_v44 }
 0x2d3   :  { %v1023_v0 = vadd.f32 %v1015_v18, %v979_v21 }
 0x2d4   :  { %v1141_v22 = vpop.permute.xlu0 %1140 }
 0x2d5   :  { %v1055_v14 = vpop.permute.xlu1 %1054 }
 0x2d6   :  { %v1059_v25 = vsel %vm495_vm3, %v1053_v54, %v1055_v14 }
 0x2d7   :  { %v1067_v30 = vadd.f32 %v1059_v25, %v1023_v0 }
 0x2d8   :  { %v1133_v4 = vpop.permute.xlu0 %1132 }
 0x2d9   :  { %v1099_v5 = vpop.permute.xlu1 %1098  ;;  %v1144_v36 = vsel %vm717_vm6, %v1133_v4, %v1864_v42  ;;  %v1158_v42 = vstv %s1922_s5 }
 0x2da   :  { %v1103_v29 = vsel %vm606_vm4, %v1097_v62, %v1099_v5  ;;  %v1152_v50 = vadd.f32 %v1144_v36, %v1108_v15 }
 0x2db   :  { %v1111_v11 = vadd.f32 %v1103_v29, %v1067_v30 }
 0x2dd   :  { %v1143_v37 = vpop.permute.xlu1 %1142 }
 0x2de   :  { %v1147_v41 = vsel %vm717_vm6, %v1141_v22, %v1143_v37 }
 0x2df   :  { %v1155_v34 = vadd.f32 %v1147_v41, %v1111_v11 }
 0x2e1   :  { %v1139_v46 = vpop.permute.xlu1 %1138  ;;  %v1305_v48 = vpack.c.bf16 %v1155_v34, %v1153_v43 }
 0x2e2   :  { %v1146_v49 = vsel %vm717_vm6, %v1139_v46, %v1141_v22 }
 0x2e3   :  { %v1154_v51 = vadd.f32 %v1146_v49, %v1110_v45  ;;  %1306 = vmatprep.subr.bf16.mxu1 %v1305_v48 }
 0x2e5   :  { %v1307_v2 = vpack.c.bf16 %v1154_v51, %v1152_v50 }
 0x2e7   :  { %1308 = vmatpush1.bf16.msra.mxu1 %v1307_v2 }
 0x2ea   :  { %1275 = vmatmul.mubr.msk.f32.vlgmr.msra.gmra.mrb[4].mxu1 %vm91_vm2, %v1156_v39 }
 0x3bd   :  { %v1228_v47 = vpop.f32.mrb[4].mxu1 }
 0x3be   :  { %v1229_v52 = vadd.f32 %v1228_v47, %v1158_v42  ;;  %v1230_v54 = vpop.f32.mrb[5].mxu1 }
 0x3bf   :  { %v1231_v55 = vadd.f32 %v1230_v54, %v1158_v42 }
 0x3c1   :  { %v1235_v57 = vcombine.low %v1229_v52, %v1231_v55 }
 0x3c3   :  { %1276 = vst.sshfl [vmem:[#allocation9] sm:$0x33 pattern:$0x76325410] %v1235_v57 }
 0x3c4   :  { %1523 = shalt.err (!%p1520_p6)
}
 0x3c5   :  { %s1524_s5 = scalar_lea.hbm %s1923_s6, 64 }
 0x3c6   :  { %p1525_p7 = scmp.ne.s32.totalorder %s1923_s6, %s1524_s5  ;;  %p1528_p8 = scmp.lt.u32.totalorder %s1524_s5, %s1923_s6 }
 0x3c8   :  { %p1530_p9 = pnand %p1528_p8, %p1525_p7 }
 0x3ca   :  { %1533 = shalt.err (!%p1530_p9)
}
 0x3cb   :  { %1254 = dma.vmem_to_hbm [thread:$0]  %s1252_s17, 64, %s1923_s6, [#allocation6]  }
 0x3cc   :  { %1538 = dma.done.wait [#allocation6], 64  }
 0x3cd   :  { %1539 = vsyncadd [#allocation6], 4294967232 }
 0x3ce   :  { %1258 = vsyncpa [#allocation5], 1 }
 0x3cf   :  { %1259 = vsyncpa [#allocation8], 1 }
 0x3d0   :  { %1260 = vsyncpa [#allocation6], 1 }

</bundles_post_ra>
